<compile_context>
chip_gen: v6e
topology: v6e:2x2x1
jax: 0.10.0
libtpu: 0.0.40
codegen_flags: <defaults>
</compile_context>

<pallas_src>
import functools

import jax
import jax.numpy as jnp
from jax import lax
from jax.experimental import pallas as pl
from jax.experimental.pallas import tpu as pltpu

TILE_C = 128                      # lanes (fast axis)
ACC_ROWS_MAX = 32                 # accumulator sublane rows (4 independent vregs)
SMALL_INPUT_FAST_PATH = 1 << 18   # below this, a fused XLA reduction wins


def _round_up(x, m):
    return (x + m - 1) // m * m


def _tpu_kind():
    try:
        return jax.devices()[0].device_kind.lower()
    except Exception:
        return ""


def _mse_sum_kernel(pred_ref, tgt_ref, out_ref, acc_ref, *,
                    block_rows, acc_rows, valid_rows, steps, mask_rows):
    c = pl.program_id(0)           # core-split axis
    i = pl.program_id(1)           # streaming / reduction axis

    @pl.when(i == 0)
    def _():
        acc_ref[...] = jnp.zeros_like(acc_ref)

    d = pred_ref[...].astype(jnp.float32) - tgt_ref[...].astype(jnp.float32)
    sq = d * d

    def _fold(x):
        # block_rows % acc_rows == 0 and acc_rows % 8 == 0, so this reshape is
        # (8,128)-tile aligned and the reduce is pure VPU work across
        # acc_rows/8 independent accumulator vregs.
        return jnp.sum(x.reshape(block_rows // acc_rows, acc_rows, TILE_C), axis=0)

    if mask_rows:
        # Only partial tail blocks / clamped duplicate blocks pay the
        # iota+compare+select; full steady-state blocks take the cheap path.
        row0 = (c * steps + i) * block_rows
        needs_mask = row0 + block_rows > valid_rows

        @pl.when(needs_mask)
        def _():
            row = row0 + lax.broadcasted_iota(jnp.int32, sq.shape, 0)
            # select (not multiply) so NaN/Inf from uninitialized OOB rows is killed.
            acc_ref[...] += _fold(jnp.where(row < valid_rows, sq, 0.0))

        @pl.when(jnp.logical_not(needs_mask))
        def _():
            acc_ref[...] += _fold(sq)
    else:
        acc_ref[...] += _fold(sq)

    @pl.when(i == steps - 1)
    def _():
        out_ref[...] = acc_ref[...]


def diffusion_loss(model_pred, target, *, block_bytes=None, num_splits=None,
                   min_pallas_elems=SMALL_INPUT_FAST_PATH, **batch):
    """Equivalent of DiffusionLoss.forward: {'loss': mean((pred - target)^2)}."""
    pred = jnp.asarray(model_pred)
    tgt = jnp.asarray(target)
    assert pred.shape == tgt.shape, "shape mismatch"
    pred = pred.reshape(-1)
    tgt = tgt.reshape(-1)
    n = pred.size

    # Small-input fast path: launch cost of pallas_call dominates below this.
    if n < max(min_pallas_elems, TILE_C):
        d = pred.astype(jnp.float32) - tgt.astype(jnp.float32)
        return {"loss": jnp.mean(d * d)}

    kind = _tpu_kind()
    is_v5e = ("v5e" in kind) or ("v5 lite" in kind) or ("v5litepod" in kind)
    is_v7 = "v7" in kind

    # Lane tail handled wrapper-side (no full-tensor pad / copy).
    main = (n // TILE_C) * TILE_C
    rows = main // TILE_C
    pred2d = pred[:main].reshape(rows, TILE_C)
    tgt2d = tgt[:main].reshape(rows, TILE_C)

    # Block sizing by bytes: ~4 MiB per input block (2 MiB on v5e).
    itemsize = max(pred2d.dtype.itemsize, tgt2d.dtype.itemsize)
    if block_bytes is None:
        block_bytes = (2 << 20) if is_v5e else (4 << 20)
    block_rows = max(8, block_bytes // (TILE_C * itemsize))
    block_rows = max(8, min(_round_up(block_rows, 8), _round_up(rows, 8)))

    acc_rows = ACC_ROWS_MAX
    while block_rows % acc_rows:
        acc_rows //= 2

    total_blocks = pl.cdiv(rows, block_rows)
    if num_splits is None:
        num_splits = 2 if is_v7 else 1        # only v7x has 2 TensorCores
    splits = max(1, min(num_splits, total_blocks))
    steps = pl.cdiv(total_blocks, splits)
    last_block = total_blocks - 1
    mask_rows = (splits * steps * block_rows) != rows

    def in_map(c, i):
        # Clamp so the shorter core split never issues a fully OOB DMA;
        # duplicated blocks are zeroed by the in-kernel row mask.
        return (jnp.minimum(c * steps + i, last_block), 0)

    # Explicit VMEM budget: double-buffered input blocks + worst-case f32 temps.
    in_buf = 2 * block_rows * TILE_C * (pred2d.dtype.itemsize + tgt2d.dtype.itemsize)
    tmp = 3 * block_rows * TILE_C * 4
    vmem_limit = int(min(max(_round_up(in_buf + tmp + (2 << 20), 1 << 20),
                             32 << 20), 56 << 20))

    if splits > 1 and is_v7:
        dim_sem = (pltpu.CORE_PARALLEL, pltpu.ARBITRARY)
    elif splits > 1:
        dim_sem = (pltpu.PARALLEL, pltpu.ARBITRARY)
    else:
        dim_sem = (pltpu.ARBITRARY, pltpu.ARBITRARY)

    cost = pl.CostEstimate(
        flops=3 * main,
        transcendentals=0,
        bytes_accessed=rows * TILE_C * (pred2d.dtype.itemsize + tgt2d.dtype.itemsize)
        + splits * acc_rows * TILE_C * 4,
    )

    partials = pl.pallas_call(
        functools.partial(
            _mse_sum_kernel,
            block_rows=block_rows,
            acc_rows=acc_rows,
            valid_rows=rows,
            steps=steps,
            mask_rows=mask_rows,
        ),
        out_shape=jax.ShapeDtypeStruct((acc_rows * splits, TILE_C), jnp.float32),
        grid_spec=pltpu.PrefetchScalarGridSpec(
            num_scalar_prefetch=0,
            grid=(splits, steps),
            in_specs=[
                pl.BlockSpec((block_rows, TILE_C), in_map),
                pl.BlockSpec((block_rows, TILE_C), in_map),
            ],
            out_specs=pl.BlockSpec((acc_rows, TILE_C), lambda c, i: (c, 0)),
            scratch_shapes=[pltpu.VMEM((acc_rows, TILE_C), jnp.float32)],
        ),
        compiler_params=pltpu.CompilerParams(
            dimension_semantics=dim_sem,
            vmem_limit_bytes=vmem_limit,
        ),
        cost_estimate=cost,
    )(pred2d, tgt2d)

    total = jnp.sum(partials)
    if main < n:
        # <128-element lane tail summed wrapper-side (tiny).
        td = pred[main:].astype(jnp.float32) - tgt[main:].astype(jnp.float32)
        total = total + jnp.sum(td * td)
    return {"loss": total * (1.0 / n)}


if __name__ == "__main__":
    key = jax.random.PRNGKey(0)
    ks = jax.random.split(key, 12)

    def ref_mse(a, b):
        return jnp.mean((a.astype(jnp.float32) - b.astype(jnp.float32)) ** 2)

    # 1) Primary case: NCHW diffusion latents [2, 4, 16, 16], f32 (fast path).
    pred = jax.random.normal(ks[0], (2, 4, 16, 16), dtype=jnp.float32)
    tgt = jax.random.normal(ks[1], (2, 4, 16, 16), dtype=jnp.float32)
    loss = jax.block_until_ready(diffusion_loss(pred, tgt)["loss"])
    assert jnp.allclose(loss, ref_mse(pred, tgt), rtol=1e-5, atol=1e-6)

    # 2) Same shapes, forced through the Pallas kernel.
    loss_k = jax.block_until_ready(
        diffusion_loss(pred, tgt, min_pallas_elems=0)["loss"])
    assert jnp.allclose(loss_k, ref_mse(pred, tgt), rtol=1e-5, atol=1e-6)

    # 3) bf16 inputs + rows not a multiple of the block (in-kernel upcast + mask).
    pred_bf = jax.random.normal(ks[2], (2, 3, 16, 16), dtype=jnp.bfloat16)
    tgt_bf = jax.random.normal(ks[3], (2, 3, 16, 16), dtype=jnp.bfloat16)
    loss_bf = jax.block_until_ready(
        diffusion_loss(pred_bf, tgt_bf, min_pallas_elems=0)["loss"])
    assert jnp.allclose(loss_bf, ref_mse(pred_bf, tgt_bf), rtol=1e-5, atol=1e-6)

    # 4) numel % 128 != 0: exercises the wrapper-side lane-tail sum (no pad).
    pred_t = jax.random.normal(ks[4], (2, 3, 5, 7), dtype=jnp.float32)
    tgt_t = jax.random.normal(ks[5], (2, 3, 5, 7), dtype=jnp.float32)
    loss_t = jax.block_until_ready(
        diffusion_loss(pred_t, tgt_t, min_pallas_elems=0)["loss"])
    assert jnp.allclose(loss_t, ref_mse(pred_t, tgt_t), rtol=1e-5, atol=1e-6)

    # 5) Tiny blocks + 2-way split: clamped duplicate block + partial-block mask.
    pred_s = jax.random.normal(ks[6], (2, 4, 16, 18), dtype=jnp.float32)
    tgt_s = jax.random.normal(ks[7], (2, 4, 16, 18), dtype=jnp.float32)
    loss_s = jax.block_until_ready(
        diffusion_loss(pred_s, tgt_s, min_pallas_elems=0,
                       block_bytes=8 * TILE_C * 4, num_splits=2)["loss"])
    assert jnp.allclose(loss_s, ref_mse(pred_s, tgt_s), rtol=1e-5, atol=1e-6)

    # 6) Moderate size: default path goes through the streaming Pallas kernel
    #    (multi-step reduction with a partial final block).
    pred_l = jax.random.normal(ks[8], (8, 8, 128, 160), dtype=jnp.float32)
    tgt_l = jax.random.normal(ks[9], (8, 8, 128, 160), dtype=jnp.float32)
    loss_l = jax.block_until_ready(diffusion_loss(pred_l, tgt_l)["loss"])
    assert jnp.allclose(loss_l, ref_mse(pred_l, tgt_l), rtol=1e-4, atol=1e-6)

    print("KERNEL_OK")
</pallas_src>

<mosaic_0001>
module attributes {stable_mosaic.version = 11 : i64} {
  func.func @_mse_sum_kernel(%arg0: i32, %arg1: i32, %arg2: memref<16x128xf32, #tpu.memory_space<vmem>>, %arg3: memref<16x128xf32, #tpu.memory_space<vmem>>, %arg4: memref<16x128xf32, #tpu.memory_space<vmem>>, %arg5: memref<16x128xf32, #tpu.memory_space<vmem>>) attributes {dimension_semantics = [#tpu.dimension_semantics<arbitrary>, #tpu.dimension_semantics<arbitrary>], iteration_bounds = array<i64: 1, 1>, scalar_prefetch = 0 : i64, scratch_operands = 1 : i64, tpu.core_type = #tpu.core_type<tc>, window_params = [{transform_indices = @transform_0, window_bounds = array<i64: 16, 128>}, {transform_indices = @transform_1, window_bounds = array<i64: 16, 128>}, {transform_indices = @transform_2, window_bounds = array<i64: 16, 128>}]} {
    %c0_i32 = arith.constant 0 : i32
    %0 = arith.cmpi eq, %arg1, %c0_i32 : i32
    %1 = arith.extui %0 : i1 to i32
    %c0_i32_0 = arith.constant 0 : i32
    %2 = arith.cmpi ne, %1, %c0_i32_0 : i32
    scf.if %2 {
      %cst_10 = arith.constant 0.000000e+00 : f32
      %15 = vector.broadcast %cst_10 : f32 to vector<16x128xf32>
      %c0_11 = arith.constant 0 : index
      %c0_12 = arith.constant 0 : index
      %16 = vector.load %arg5[%c0_11, %c0_12] : memref<16x128xf32, #tpu.memory_space<vmem>>, vector<16x128xf32>
      tpu.vector_store %arg5[%c0_11, %c0_12], %15 {strides = array<i32>} : memref<16x128xf32, #tpu.memory_space<vmem>>, vector<16x128xf32>,
    } else {
    }
    %c0 = arith.constant 0 : index
    %c0_1 = arith.constant 0 : index
    %3 = vector.load %arg2[%c0, %c0_1] : memref<16x128xf32, #tpu.memory_space<vmem>>, vector<16x128xf32>
    %c0_2 = arith.constant 0 : index
    %c0_3 = arith.constant 0 : index
    %4 = vector.load %arg3[%c0_2, %c0_3] : memref<16x128xf32, #tpu.memory_space<vmem>>, vector<16x128xf32>
    %5 = arith.subf %3, %4 : vector<16x128xf32>
    %6 = arith.mulf %5, %5 : vector<16x128xf32>
    %c0_4 = arith.constant 0 : index
    %c0_5 = arith.constant 0 : index
    %7 = vector.load %arg5[%c0_4, %c0_5] : memref<16x128xf32, #tpu.memory_space<vmem>>, vector<16x128xf32>
    %8 = vector.shape_cast %6 : vector<16x128xf32> to vector<1x16x128xf32>
    %cst = arith.constant dense<0.000000e+00> : vector<16x128xf32>
    %9 = vector.multi_reduction <add>, %8, %cst [0] : vector<1x16x128xf32> to vector<16x128xf32>
    %10 = arith.addf %7, %9 : vector<16x128xf32>
    %c0_6 = arith.constant 0 : index
    %c0_7 = arith.constant 0 : index
    %11 = vector.load %arg5[%c0_6, %c0_7] : memref<16x128xf32, #tpu.memory_space<vmem>>, vector<16x128xf32>
    tpu.vector_store %arg5[%c0_6, %c0_7], %10 {strides = array<i32>} : memref<16x128xf32, #tpu.memory_space<vmem>>, vector<16x128xf32>,
    %c0_i32_8 = arith.constant 0 : i32
    %12 = arith.cmpi eq, %arg1, %c0_i32_8 : i32
    %13 = arith.extui %12 : i1 to i32
    %c0_i32_9 = arith.constant 0 : i32
    %14 = arith.cmpi ne, %13, %c0_i32_9 : i32
    scf.if %14 {
      %c0_10 = arith.constant 0 : index
      %c0_11 = arith.constant 0 : index
      %15 = vector.load %arg5[%c0_10, %c0_11] : memref<16x128xf32, #tpu.memory_space<vmem>>, vector<16x128xf32>
      %c0_12 = arith.constant 0 : index
      %c0_13 = arith.constant 0 : index
      %16 = vector.load %arg4[%c0_12, %c0_13] : memref<16x128xf32, #tpu.memory_space<vmem>>, vector<16x128xf32>
      tpu.vector_store %arg4[%c0_12, %c0_13], %15 {strides = array<i32>} : memref<16x128xf32, #tpu.memory_space<vmem>>, vector<16x128xf32>,
    } else {
    }
    return
  }
  func.func @transform_0(%arg0: i32, %arg1: i32) -> (i32, i32) {
    %c1_i32 = arith.constant 1 : i32
    %0 = arith.muli %arg0, %c1_i32 : i32
    %1 = arith.addi %0, %arg1 : i32
    %c0_i32 = arith.constant 0 : i32
    %2 = arith.minsi %1, %c0_i32 : i32
    %c0_i32_0 = arith.constant 0 : i32
    %c0_i32_1 = arith.constant 0 : i32
    return %2, %c0_i32_0 : i32, i32
  }
  func.func @transform_1(%arg0: i32, %arg1: i32) -> (i32, i32) {
    %c1_i32 = arith.constant 1 : i32
    %0 = arith.muli %arg0, %c1_i32 : i32
    %1 = arith.addi %0, %arg1 : i32
    %c0_i32 = arith.constant 0 : i32
    %2 = arith.minsi %1, %c0_i32 : i32
    %c0_i32_0 = arith.constant 0 : i32
    %c0_i32_1 = arith.constant 0 : i32
    return %2, %c0_i32_0 : i32, i32
  }
  func.func @transform_2(%arg0: i32, %arg1: i32) -> (i32, i32) {
    %c0_i32 = arith.constant 0 : i32
    %c0_i32_0 = arith.constant 0 : i32
    return %arg0, %c0_i32 : i32, i32
  }
}

</mosaic_0001>

<bundles_post_ra>
// kernel: tpu_custom_call.1
= control target key start
LH: loop header
LB: loop body
LE: loop exit
PB: predicated region body
PF: predicated region fallthrough
CT: control target
= control target key end

     0   :  { %7 = vsyncpa [#allocation4], 0  ;;  %s220_s0 = inlined_call_operand.hbm [shape: f32[16,128], index: 0, kind: input, shape index: {}]   ;;  %s221_s1 = inlined_call_operand.hbm [shape: f32[16,128], index: 1, kind: input, shape index: {}]   ;;  %s222_s2 = inlined_call_operand.hbm [shape: f32[16,128], index: 2, kind: output, shape index: {}]  }
   0x1   :  { %8 = vsyncpa [#allocation7], 0 }
   0x2   :  { %9 = vsyncpa [#allocation5], 0  ;;  %s182_s9 = smov [#allocation3]  }
   0x3   :  { %s21_s10 = sshll.u32 %s182_s9, 4  ;;  %s22_s10 = int_to_ptr.vmem [resolvable:$true] %s21_s10 }
   0x4   :  { %s124_s11 = scalar_lea.vmem %s22_s10, 256  ;;  %p129_p1 = scmp.lt.s32.totalorder %s22_s10, %s22_s10 }
   0x5   :  { %p125_p0 = scmp.ne.s32.totalorder %s22_s10, %s124_s11  ;;  %p130_p2 = scmp.lt.s32.totalorder %s124_s11, %s124_s11 }
   0x7   :  { %p131_p3 = por %p130_p2, %p129_p1 }
   0x9   :  { %p132_p4 = pnand %p131_p3, %p125_p0 }
   0xb   :  { %135 = shalt.err (!%p132_p4)
}
   0xc   :  { %s183_s12 = smov 128   ;;  %s184_s13 = smov 8  }
   0xd   :  { %27 = dma.hbm_to_vmem [thread:$0]  %s220_s0, 256, %s22_s10, [#allocation4], %s183_s12, %s183_s12, %s184_s13  }
   0xe   :  { %s185_s16 = smov [#allocation6]  }
   0xf   :  { %s39_s17 = sshll.u32 %s185_s16, 4  ;;  %s40_s17 = int_to_ptr.vmem [resolvable:$true] %s39_s17 }
  0x10   :  { %s144_s18 = scalar_lea.vmem %s40_s17, 256  ;;  %p149_p6 = scmp.lt.s32.totalorder %s40_s17, %s40_s17 }
  0x11   :  { %p145_p5 = scmp.ne.s32.totalorder %s40_s17, %s144_s18  ;;  %p150_p7 = scmp.lt.s32.totalorder %s144_s18, %s144_s18 }
  0x13   :  { %p151_p8 = por %p150_p7, %p149_p6 }
  0x15   :  { %p152_p9 = pnand %p151_p8, %p145_p5 }
  0x17   :  { %155 = shalt.err (!%p152_p9)
}
  0x18   :  { %45 = dma.hbm_to_vmem [thread:$0]  %s221_s1, 256, %s40_s17, [#allocation7], %s183_s12, %s183_s12, %s184_s13  }
  0x19   :  { %176 = dma.done.wait [#allocation4], 256  }
  0x1a   :  { %177 = vsyncadd [#allocation4], 4294967040 }
  0x1b   :  { %178 = dma.done.wait [#allocation7], 256  }
  0x1c   :  { %179 = vsyncadd [#allocation7], 4294967040  ;;  %v66_v0 = vld [vmem:[#allocation3] sm:$0xff]  ;;  %v68_v1 = vld [vmem:[#allocation6] sm:$0xff]  ;;  %s186_s0 = smov [#allocation8]  }
  0x1d   :  { %v67_v2 = vld [vmem:[#allocation3 + $0x8] sm:$0xff]  ;;  %v70_v3 = vsub.f32 %v66_v0, %v68_v1  ;;  %v69_v4 = vld [vmem:[#allocation6 + $0x8] sm:$0xff]  ;;  %s94_s21 = sshll.u32 %s186_s0, 4  ;;  %s95_s21 = int_to_ptr.vmem [resolvable:$true] %s94_s21 }
  0x1e   :  { %v71_v5 = vsub.f32 %v67_v2, %v69_v4  ;;  %s156_s22 = scalar_lea.vmem %s95_s21, 256  ;;  %p161_p11 = scmp.lt.s32.totalorder %s95_s21, %s95_s21 }
  0x1f   :  { %v72_v6 = vmul.f32 %v70_v3, %v70_v3  ;;  %p157_p10 = scmp.ne.s32.totalorder %s95_s21, %s156_s22  ;;  %p162_p12 = scmp.lt.s32.totalorder %s156_s22, %s156_s22 }
  0x20   :  { %v73_v7 = vmul.f32 %v71_v5, %v71_v5 }
  0x21   :  { %87 = vst [vmem:[#allocation8] sm:$0xff] %v72_v6  ;;  %p163_p13 = por %p162_p12, %p161_p11 }
  0x22   :  { %88 = vst [vmem:[#allocation8 + $0x8] sm:$0xff] %v73_v7 }
  0x23   :  { %p164_p0 = pnand %p163_p13, %p157_p10 }
  0x25   :  { %167 = shalt.err (!%p164_p0)
}
  0x26   :  { %100 = dma.vmem_to_hbm [thread:$0]  %s95_s21, 256, %s222_s2, [#allocation5], %s183_s12, %s183_s12, %s184_s13  }
  0x27   :  { %180 = dma.done.wait [#allocation5], 256  }
  0x28   :  { %181 = vsyncadd [#allocation5], 4294967040 }
  0x29   :  { %104 = vsyncpa [#allocation4], 1 }
  0x2a   :  { %105 = vsyncpa [#allocation7], 1 }
  0x2b   :  { %106 = vsyncpa [#allocation5], 1 }

</bundles_post_ra>
